<compile_context>
chip_gen: v7x
topology: tpu7x:2x2x1
jax: 0.10.0
libtpu: 0.0.40
codegen_flags: <defaults>
</compile_context>

<pallas_src>
import jax
import jax.numpy as jnp
from jax import lax
from jax.experimental import pallas as pl
from jax.experimental.pallas import tpu as pltpu


def _round_up(x, m):
    return (x + m - 1) // m * m


def _mlp_kernel(x_ref, w1_ref, b1_ref, w2_ref, b2_ref, o_ref):
    # x_ref:  (TB, D_in)        w1_ref: (H, D_in)       [PyTorch layout]
    # b1_ref: (1, H)            w2_ref: (D_out_p, H)    [PyTorch layout]
    # b2_ref: (1, D_out_p)      o_ref:  (TB, D_out_p)
    x = x_ref[...]
    # x @ w1.T without materializing a transpose: contract dim 1 of both operands.
    h = lax.dot_general(
        x, w1_ref[...],
        dimension_numbers=(((1,), (1,)), ((), ())),
        preferred_element_type=jnp.float32,
    )
    h = jnp.maximum(h + b1_ref[...], 0.0)          # bias + ReLU on the VPU (f32)
    out = lax.dot_general(
        h, w2_ref[...],
        dimension_numbers=(((1,), (1,)), ((), ())),
        preferred_element_type=jnp.float32,
    ) + b2_ref[...]
    o_ref[...] = out.astype(o_ref.dtype)


def mlp_forward(x2d, w1, b1, w2, b2, *, tile_b=256):
    """Fused fc1 -> ReLU -> fc2.

    x2d: (B, D_in); w1: (H, D_in); b1: (H,); w2: (D_out, H); b2: (D_out,).
    Weights stay in PyTorch (out_features, in_features) layout.
    """
    B, D_in = x2d.shape
    H = w1.shape[0]
    D_out = w2.shape[0]

    # Lane-dense output: pad the output feature dim up to a multiple of 128.
    D_out_p = _round_up(D_out, 128)
    if D_out_p != D_out:
        w2 = jnp.pad(w2, ((0, D_out_p - D_out), (0, 0)))
        b2 = jnp.pad(b2, ((0, D_out_p - D_out),))
    b1_2d = b1.reshape(1, H)
    b2_2d = b2.reshape(1, D_out_p)

    if B <= tile_b:
        # Small batch: no grid at all -> no per-step pipeline bookkeeping.
        vmem = pl.BlockSpec(memory_space=pltpu.MemorySpace.VMEM)
        out_p = pl.pallas_call(
            _mlp_kernel,
            out_shape=jax.ShapeDtypeStruct((B, D_out_p), x2d.dtype),
            in_specs=[vmem, vmem, vmem, vmem, vmem],
            out_specs=pl.BlockSpec(memory_space=pltpu.MemorySpace.VMEM),
        )(x2d, w1, b1_2d, w2, b2_2d)
        return out_p[:, :D_out]

    # Large batch: tile over B; weights / biases stay resident in VMEM across steps.
    B_p = _round_up(B, tile_b)
    if B_p != B:
        x2d = jnp.pad(x2d, ((0, B_p - B), (0, 0)))
    grid = (B_p // tile_b,)
    out_p = pl.pallas_call(
        _mlp_kernel,
        out_shape=jax.ShapeDtypeStruct((B_p, D_out_p), x2d.dtype),
        grid=grid,
        in_specs=[
            pl.BlockSpec((tile_b, D_in), lambda i: (i, 0)),      # activations: tiled
            pl.BlockSpec((H, D_in), lambda i: (0, 0)),           # weights: resident
            pl.BlockSpec((1, H), lambda i: (0, 0)),
            pl.BlockSpec((D_out_p, H), lambda i: (0, 0)),
            pl.BlockSpec((1, D_out_p), lambda i: (0, 0)),
        ],
        out_specs=pl.BlockSpec((tile_b, D_out_p), lambda i: (i, 0)),
        compiler_params=pltpu.CompilerParams(
            dimension_semantics=("parallel",),
        ),
    )(x2d, w1, b1_2d, w2, b2_2d)
    return out_p[:B, :D_out]


def bow_predictor_forward(inputs, w1, b1, w2, b2):
    """BowPredictor.forward: MLP over the last dim, then torch-style .squeeze(0)."""
    lead = inputs.shape[:-1]
    d_in = inputs.shape[-1]
    x2d = inputs.reshape(-1, d_in)
    out = mlp_forward(x2d, w1, b1, w2, b2)
    out = out.reshape(*lead, w2.shape[0])
    if out.ndim > 0 and out.shape[0] == 1:       # .squeeze(0) semantics
        out = jnp.squeeze(out, axis=0)
    return out


def bow_predictor_reference(inputs, w1, b1, w2, b2):
    h = jnp.maximum(inputs @ w1.T + b1, 0.0)
    out = h @ w2.T + b2
    if out.ndim > 0 and out.shape[0] == 1:
        out = jnp.squeeze(out, axis=0)
    return out


if __name__ == "__main__":
    code_size = 32       # input_size
    hidden_size = 64
    vocab_size = 16      # output_size

    key = jax.random.PRNGKey(0)
    kx, kw1, kb1, kw2, kb2, kx2 = jax.random.split(key, 6)

    # Deterministic parameter init (mimicking nn.Linear's uniform fan-in init).
    bound1 = 1.0 / (code_size ** 0.5)
    w1 = jax.random.uniform(kw1, (hidden_size, code_size), jnp.float32, -bound1, bound1)
    b1 = jax.random.uniform(kb1, (hidden_size,), jnp.float32, -bound1, bound1)
    bound2 = 1.0 / (hidden_size ** 0.5)
    w2 = jax.random.uniform(kw2, (vocab_size, hidden_size), jnp.float32, -bound2, bound2)
    b2 = jax.random.uniform(kb2, (vocab_size,), jnp.float32, -bound2, bound2)

    # Case 1: typical BowPredictor input (1, batch, code_size) -> squeeze(0) -> (batch, vocab).
    x_small = jax.random.normal(kx, (1, 8, code_size), dtype=jnp.float32)
    out_small = jax.block_until_ready(bow_predictor_forward(x_small, w1, b1, w2, b2))
    ref_small = bow_predictor_reference(x_small, w1, b1, w2, b2)
    assert out_small.shape == (8, vocab_size)
    assert jnp.allclose(out_small, ref_small, atol=1e-5, rtol=1e-5)

    # Case 2: larger batch exercises the batch-tiled (gridded, weights-resident) path.
    x_big = jax.random.normal(kx2, (512, code_size), dtype=jnp.float32)
    out_big = jax.block_until_ready(bow_predictor_forward(x_big, w1, b1, w2, b2))
    ref_big = bow_predictor_reference(x_big, w1, b1, w2, b2)
    assert out_big.shape == (512, vocab_size)
    assert jnp.allclose(out_big, ref_big, atol=1e-5, rtol=1e-5)

    print("KERNEL_OK")
</pallas_src>

<mosaic_0001>
module attributes {stable_mosaic.version = 11 : i64} {
  func.func @_mlp_kernel(%arg0: memref<8x32xf32, #tpu.memory_space<vmem>>, %arg1: memref<64x32xf32, #tpu.memory_space<vmem>>, %arg2: memref<1x64xf32, #tpu.memory_space<vmem>>, %arg3: memref<128x64xf32, #tpu.memory_space<vmem>>, %arg4: memref<1x128xf32, #tpu.memory_space<vmem>>, %arg5: memref<8x128xf32, #tpu.memory_space<vmem>>) attributes {dimension_semantics = [], scalar_prefetch = 0 : i64, scratch_operands = 0 : i64, tpu.core_type = #tpu.core_type<tc>} {
    %c0 = arith.constant 0 : index
    %c0_0 = arith.constant 0 : index
    %0 = vector.load %arg0[%c0, %c0_0] : memref<8x32xf32, #tpu.memory_space<vmem>>, vector<8x32xf32>
    %c0_1 = arith.constant 0 : index
    %c0_2 = arith.constant 0 : index
    %1 = vector.load %arg1[%c0_1, %c0_2] : memref<64x32xf32, #tpu.memory_space<vmem>>, vector<64x32xf32>
    %cst = arith.constant dense<0.000000e+00> : vector<8x64xf32>
    %2 = tpu.matmul %0, %1, %cst {dimension_numbers = #tpu.dot_dimension_numbers<[1], [1], [0], [0], [0, 0, 1, 0], [], []>} : vector<8x32xf32>, vector<64x32xf32>, vector<8x64xf32> -> vector<8x64xf32>
    %c0_3 = arith.constant 0 : index
    %c0_4 = arith.constant 0 : index
    %3 = vector.load %arg2[%c0_3, %c0_4] : memref<1x64xf32, #tpu.memory_space<vmem>>, vector<1x64xf32>
    %4 = vector.broadcast %3 : vector<1x64xf32> to vector<8x64xf32>
    %5 = arith.addf %2, %4 : vector<8x64xf32>
    %cst_5 = arith.constant 0.000000e+00 : f32
    %6 = vector.broadcast %cst_5 : f32 to vector<8x64xf32>
    %7 = arith.maximumf %5, %6 : vector<8x64xf32>
    %c0_6 = arith.constant 0 : index
    %c0_7 = arith.constant 0 : index
    %8 = vector.load %arg3[%c0_6, %c0_7] : memref<128x64xf32, #tpu.memory_space<vmem>>, vector<128x64xf32>
    %cst_8 = arith.constant dense<0.000000e+00> : vector<8x128xf32>
    %9 = tpu.matmul %7, %8, %cst_8 {dimension_numbers = #tpu.dot_dimension_numbers<[1], [1], [0], [0], [0, 0, 1, 0], [], []>} : vector<8x64xf32>, vector<128x64xf32>, vector<8x128xf32> -> vector<8x128xf32>
    %c0_9 = arith.constant 0 : index
    %c0_10 = arith.constant 0 : index
    %10 = vector.load %arg4[%c0_9, %c0_10] : memref<1x128xf32, #tpu.memory_space<vmem>>, vector<1x128xf32>
    %11 = vector.broadcast %10 : vector<1x128xf32> to vector<8x128xf32>
    %12 = arith.addf %9, %11 : vector<8x128xf32>
    %c0_11 = arith.constant 0 : index
    %c0_12 = arith.constant 0 : index
    %13 = vector.load %arg5[%c0_11, %c0_12] : memref<8x128xf32, #tpu.memory_space<vmem>>, vector<8x128xf32>
    tpu.vector_store %arg5[%c0_11, %c0_12], %12 {strides = array<i32>} : memref<8x128xf32, #tpu.memory_space<vmem>>, vector<8x128xf32>,
    return
  }
}

</mosaic_0001>

<bundles_post_ra>
// kernel: tpu_custom_call.1
= control target key start
LH: loop header
LB: loop body
LE: loop exit
PB: predicated region body
PF: predicated region fallthrough
CT: control target
= control target key end

     0   :  { %vm37_vm0 = vcmask 261120   ;;  %v480_v2 = vmov 0.0|0.0   ;;  %vm159_vm2 = vcmask 523264   ;;  %vm481_vm3 = vmmov 0   ;;  %s657_s0 = inlined_call_operand.vmem [shape: f32[8,32], index: 0, kind: input, shape index: {}]   ;;  %s658_s1 = inlined_call_operand.vmem [shape: f32[64,32], index: 1, kind: input, shape index: {}]   ;;  %s659_s2 = inlined_call_operand.vmem [shape: f32[1,64], index: 2, kind: input, shape index: {}]   ;;  %s660_s3 = inlined_call_operand.vmem [shape: f32[128,64], index: 3, kind: input, shape index: {}]   ;;  %s661_s4 = inlined_call_operand.vmem [shape: f32[1,128], index: 4, kind: input, shape index: {}]   ;;  %s662_s5 = inlined_call_operand.hbm [shape: f32[8,128], index: 5, kind: output, shape index: {}]  }
   0x1   :  { %v22_v0 = vld [vmem:[%s658_s1] sm:$0xff]  ;;  %v23_v1 = vld [vmem:[%s658_s1 + $0x8] sm:$0xff]  ;;  %404 = vmatprep.subr.bf16.mxu0 %v480_v2  ;;  %vm523_vm1 = vmpackc.low %vm37_vm0, %vm37_vm0  ;;  %420 = vmatprep.subr.bf16.mxu1 %v480_v2  ;;  %v482_v5 = vmov 0.0  }
   0x2   :  { %v405_v3 = vpack.c.bf16 %v23_v1, %v22_v0  ;;  %366 = vmatprep.mubr.msk.f32.mxu0 %vm481_vm3, %v482_v5  ;;  %401 = vmatprep.mubr.msk.f32.mxu1 %vm481_vm3, %v482_v5  ;;  %v136_v6 = vld [vmem:[%s660_s3] sm:$0xff]  ;;  %v137_v7 = vld [vmem:[%s660_s3 + $0x8] sm:$0xff]  ;;  %v24_v8 = vld [vmem:[%s658_s1 + $0x10] sm:$0xff] }
   0x3   :  { %v25_v9 = vld [vmem:[%s658_s1 + $0x18] sm:$0xff]  ;;  %v421_v10 = vpack.c.bf16 %v137_v7, %v136_v6  ;;  %vm545_vm4 = vmpackc.low %vm159_vm2, %vm159_vm2  ;;  %v138_v13 = vld [vmem:[%s660_s3 + $0x10] sm:$0xff] }
   0x4   :  { %407 = vmatpush3.bf16.xpose.msk.msra.mxu0 %vm523_vm1, %v405_v3  ;;  %v409_v12 = vpack.c.bf16 %v25_v9, %v24_v8  ;;  %v139_v14 = vld [vmem:[%s660_s3 + $0x18] sm:$0xff] }
   0x5   :  { %408 = vmatprep.subr.bf16.mxu0 %v480_v2  ;;  %423 = vmatpush3.bf16.xpose.msk.msra.mxu1 %vm545_vm4, %v421_v10 }
   0x6   :  { %424 = vmatprep.subr.bf16.mxu1 %v480_v2 }
   0x7   :  { %10 = vsyncpa [#allocation3], 0  ;;  %v425_v15 = vpack.c.bf16 %v139_v14, %v138_v13  ;;  %v26_v16 = vld [vmem:[%s658_s1 + $0x20] sm:$0xff]  ;;  %v27_v17 = vld [vmem:[%s658_s1 + $0x28] sm:$0xff]  ;;  %s483_s20 = smov [#allocation2]  }
   0x8   :  { %v413_v18 = vpack.c.bf16 %v27_v17, %v26_v16  ;;  %v140_v19 = vld [vmem:[%s660_s3 + $0x20] sm:$0xff]  ;;  %v141_v20 = vld [vmem:[%s660_s3 + $0x28] sm:$0xff]  ;;  %v28_v22 = vld [vmem:[%s658_s1 + $0x30] sm:$0xff] }
   0x9   :  { %v429_v21 = vpack.c.bf16 %v141_v20, %v140_v19  ;;  %v29_v23 = vld [vmem:[%s658_s1 + $0x38] sm:$0xff]  ;;  %v142_v25 = vld [vmem:[%s660_s3 + $0x30] sm:$0xff]  ;;  %v21_v28 = vld [vmem:[%s657_s0] sm:$0xff] }
   0xa   :  { %v417_v24 = vpack.c.bf16 %v29_v23, %v28_v22  ;;  %v143_v26 = vld [vmem:[%s660_s3 + $0x38] sm:$0xff]  ;;  %v144_v29 = vld [vmem:[%s660_s3 + $0x40] sm:$0xff]  ;;  %v145_v30 = vld [vmem:[%s660_s3 + $0x48] sm:$0xff] }
   0xb   :  { %v433_v27 = vpack.c.bf16 %v143_v26, %v142_v25  ;;  %v437_v31 = vpack.c.bf16 %v145_v30, %v144_v29  ;;  %v146_v32 = vld [vmem:[%s660_s3 + $0x50] sm:$0xff]  ;;  %v147_v33 = vld [vmem:[%s660_s3 + $0x58] sm:$0xff]  ;;  %v148_v35 = vld [vmem:[%s660_s3 + $0x60] sm:$0xff] }
   0xc   :  { %411 = vmatpush3.bf16.xpose.msk.msra.mxu0 %vm523_vm1, %v409_v12  ;;  %v441_v34 = vpack.c.bf16 %v147_v33, %v146_v32  ;;  %v149_v36 = vld [vmem:[%s660_s3 + $0x68] sm:$0xff]  ;;  %v150_v38 = vld [vmem:[%s660_s3 + $0x70] sm:$0xff]  ;;  %v151_v39 = vld [vmem:[%s660_s3 + $0x78] sm:$0xff]  ;;  %s288_s3 = sshll.u32 %s483_s20, 4  ;;  %s289_s3 = int_to_ptr.vmem [resolvable:$true] %s288_s3 }
   0xd   :  { %412 = vmatprep.subr.bf16.mxu0 %v480_v2  ;;  %427 = vmatpush3.bf16.xpose.msk.msra.mxu1 %vm545_vm4, %v425_v15  ;;  %v445_v37 = vpack.c.bf16 %v149_v36, %v148_v35  ;;  %v449_v40 = vpack.c.bf16 %v151_v39, %v150_v38  ;;  %v296_v41 = vld [vmem:[%s659_s2] ss:$0 sm:$0xff]  ;;  %s456_s21 = scalar_lea.vmem %s289_s3, 128  ;;  %p461_p1 = scmp.lt.s32.totalorder %s289_s3, %s289_s3 }
   0xe   :  { %428 = vmatprep.subr.bf16.mxu1 %v480_v2  ;;  %v306_v46 = vld [vmem:[%s661_s4] ss:$0 sm:$0xff]  ;;  %p457_p0 = scmp.ne.s32.totalorder %s289_s3, %s456_s21  ;;  %p462_p2 = scmp.lt.s32.totalorder %s456_s21, %s456_s21 }
  0x10   :  { %p463_p3 = por %p462_p2, %p461_p1 }
  0x12   :  { %p464_p4 = pnand %p463_p3, %p457_p0 }
  0x14   :  { %415 = vmatpush3.bf16.xpose.msk.msra.mxu0 %vm523_vm1, %v413_v18 }
  0x15   :  { %416 = vmatprep.subr.bf16.mxu0 %v480_v2  ;;  %431 = vmatpush3.bf16.xpose.msk.msra.mxu1 %vm545_vm4, %v429_v21 }
  0x16   :  { %432 = vmatprep.subr.bf16.mxu1 %v480_v2 }
  0x1c   :  { %419 = vmatpush3.bf16.xpose.msk.msra.mxu0 %vm523_vm1, %v417_v24 }
  0x1d   :  { %435 = vmatpush3.bf16.xpose.msk.msra.mxu1 %vm545_vm4, %v433_v27 }
  0x1e   :  { %436 = vmatprep.subr.bf16.mxu1 %v480_v2 }
  0x23   :  { %367 = vmatmul.mubr.msk.f32.vlgmr.msra.gmra.mrb[0].mxu0 %vm37_vm0, %v21_v28 }
  0x25   :  { %439 = vmatpush3.bf16.xpose.msk.msra.mxu1 %vm545_vm4, %v437_v31 }
  0x26   :  { %440 = vmatprep.subr.bf16.mxu1 %v480_v2 }
  0x2d   :  { %443 = vmatpush3.bf16.xpose.msk.msra.mxu1 %vm545_vm4, %v441_v34 }
  0x2e   :  { %444 = vmatprep.subr.bf16.mxu1 %v480_v2 }
  0x35   :  { %447 = vmatpush3.bf16.xpose.msk.msra.mxu1 %vm545_vm4, %v445_v37 }
  0x36   :  { %448 = vmatprep.subr.bf16.mxu1 %v480_v2 }
  0x3d   :  { %451 = vmatpush3.bf16.xpose.msk.msra.mxu1 %vm545_vm4, %v449_v40 }
  0xf6   :  { %v131_v42 = vpop.f32.mrb[0].mxu0 }
  0xf7   :  { %v132_v43 = vadd.f32 %v296_v41, %v131_v42  ;;  %v368_v44 = vpop.f32.mrb[1].mxu0 }
  0xf9   :  { %v135_v45 = vmax.f32 %v132_v43, 0.0 }
  0xfb   :  { %402 = vmatmul.mubr.msk.f32.vlgmr.msra.gmra.mrb[0].mxu1 %vm159_vm2, %v135_v45 }
 0x1ce   :  { %v277_v47 = vpop.f32.mrb[0].mxu1 }
 0x1cf   :  { %v278_v48 = vadd.f32 %v306_v46, %v277_v47  ;;  %v403_v49 = vpop.f32.mrb[1].mxu1 }
 0x1d1   :  { %281 = vst [vmem:[#allocation2] sm:$0xff] %v278_v48 }
 0x1d2   :  { %467 = shalt.err (!%p464_p4)
}
 0x1d3   :  { %s468_s23 = scalar_lea.hbm %s662_s5, 128 }
 0x1d4   :  { %p469_p5 = scmp.ne.s32.totalorder %s662_s5, %s468_s23  ;;  %p472_p6 = scmp.lt.u32.totalorder %s468_s23, %s662_s5 }
 0x1d6   :  { %p474_p7 = pnand %p472_p6, %p469_p5 }
 0x1d8   :  { %477 = shalt.err (!%p474_p7)
}
 0x1d9   :  { %291 = dma.vmem_to_hbm [thread:$0]  %s289_s3, 128, %s662_s5, [#allocation3]  }
 0x1da   :  { %478 = dma.done.wait [#allocation3], 128  }
 0x1db   :  { %479 = vsyncadd [#allocation3], 4294967168 }
 0x1dc   :  { %295 = vsyncpa [#allocation3], 1 }

</bundles_post_ra>
